<compile_context>
chip_gen: v5e
topology: v5e:2x2
jax: 0.10.0
libtpu: 0.0.40
codegen_flags: <defaults>
</compile_context>

<pallas_src>
import functools

import jax
import jax.numpy as jnp
from jax.experimental import pallas as pl
from jax.experimental.pallas import tpu as pltpu

IN_FEATURES = 28 * 28        # 784
HIDDEN = 50
OUT = 10
HIDDEN_PAD = 128             # lane-padded hidden width (contraction dim of 2nd matmul)
DEFAULT_B_TILE = 2048        # rows per grid step (multiple of 8)


def _round_up(n, m):
    return ((n + m - 1) // m) * m


def mlp_kernel(x_ref, w1_ref, b1_ref, w2_ref, b2_ref, o_ref, *, mxu_bf16):
    # Two MXU matmuls with f32 accumulation; bias add + ReLU on the VPU in f32.
    x = x_ref[...]                                   # (bt, 784)
    w1 = w1_ref[...]                                 # (784, 128)
    if mxu_bf16:                                     # in-kernel cast: cheap VPU work,
        x = x.astype(jnp.bfloat16)                   # no change in HBM bytes
        w1 = w1.astype(jnp.bfloat16)
    h = jnp.dot(x, w1, preferred_element_type=jnp.float32)
    h = jnp.maximum(h + b1_ref[...], 0.0)            # (bt, 128) f32

    w2 = w2_ref[...]                                 # (128, 10)
    if mxu_bf16:
        h = h.astype(jnp.bfloat16)
        w2 = w2.astype(jnp.bfloat16)
    logits = jnp.dot(h, w2, preferred_element_type=jnp.float32)
    o_ref[...] = (logits + b2_ref[...]).astype(o_ref.dtype)   # (bt, 10)


def prepare_params(w1, b1, w2, b2):
    """One-time (outside the per-call forward) zero-padding of the tiny hidden dim
    to the 128-lane width.  Zero columns of W1 give h = ReLU(0) = 0 and the matching
    zero rows of W2 contribute 0, so the padding is numerically exact."""
    w1p = jnp.zeros((IN_FEATURES, HIDDEN_PAD), jnp.float32).at[:, :HIDDEN].set(w1)
    b1p = jnp.zeros((1, HIDDEN_PAD), jnp.float32).at[:, :HIDDEN].set(b1.reshape(1, -1))
    w2p = jnp.zeros((HIDDEN_PAD, OUT), jnp.float32).at[:HIDDEN, :].set(w2)
    b2p = b2.reshape(1, OUT).astype(jnp.float32)
    return w1p, b1p, w2p, b2p


@functools.partial(jax.jit, static_argnames=("b_tile", "mxu_bf16"))
def mlp_forward(x_nchw, w1p, b1p, w2p, b2p, *, b_tile=DEFAULT_B_TILE, mxu_bf16=False):
    """x_nchw: (B, 1, 28, 28) f32; padded params from prepare_params().
    Returns logits (B, 10) f32."""
    B = x_nchw.shape[0]
    x2 = x_nchw.reshape(B, -1)     # nn.Flatten: metadata-only reshape (contiguous)

    # Batch tile: multiple of 8 sublanes; capped at ~B/2 so large batches get >= 2
    # grid steps (keeps the 2nd v7x TensorCore busy); no padding of x — the last
    # grid block is ragged and Pallas clips its writeback to the valid rows.
    bt = min(b_tile, _round_up(B, 8))
    if B > 8:
        bt = min(bt, _round_up(pl.cdiv(B, 2), 8))
    bt = max(bt, 8)
    grid = (pl.cdiv(B, bt),)

    flops = 2 * B * IN_FEATURES * HIDDEN_PAD + 2 * B * HIDDEN_PAD * OUT
    bytes_accessed = 4 * (B * IN_FEATURES + B * OUT
                          + IN_FEATURES * HIDDEN_PAD + HIDDEN_PAD
                          + HIDDEN_PAD * OUT + OUT)

    kernel = functools.partial(mlp_kernel, mxu_bf16=mxu_bf16)
    out = pl.pallas_call(
        kernel,
        out_shape=jax.ShapeDtypeStruct((B, OUT), jnp.float32),
        grid=grid,
        in_specs=[
            # x: streamed per batch tile (auto double-buffered by Pallas).
            pl.BlockSpec((bt, IN_FEATURES), lambda i: (i, 0)),
            # weights / biases: grid-invariant index_maps -> stay resident in VMEM.
            pl.BlockSpec((IN_FEATURES, HIDDEN_PAD), lambda i: (0, 0)),
            pl.BlockSpec((1, HIDDEN_PAD), lambda i: (0, 0)),
            pl.BlockSpec((HIDDEN_PAD, OUT), lambda i: (0, 0)),
            pl.BlockSpec((1, OUT), lambda i: (0, 0)),
        ],
        # Narrow (bt, 10) block: last dim equals full array dim, so it is legal;
        # writeback is only 40 B/row instead of 512 B/row of padded lanes.
        out_specs=pl.BlockSpec((bt, OUT), lambda i: (i, 0)),
        compiler_params=pltpu.CompilerParams(
            dimension_semantics=("parallel",),       # v7x: split batch over 2 TCs
            vmem_limit_bytes=48 * 1024 * 1024,       # headroom for bt=2048 tiles
        ),
        cost_estimate=pl.CostEstimate(
            flops=flops, transcendentals=0, bytes_accessed=bytes_accessed),
    )(x2, w1p, b1p, w2p, b2p)
    return out


def init_params(key):
    """Matches torch layer shapes: Linear(784,50) W1 (784,50) b1 (1,50);
    Linear(50,10) W2 (50,10) b2 (1,10)."""
    k1, k2, k3, k4 = jax.random.split(key, 4)
    lim1 = 1.0 / jnp.sqrt(784.0)
    lim2 = 1.0 / jnp.sqrt(50.0)
    w1 = jax.random.uniform(k1, (IN_FEATURES, HIDDEN), jnp.float32, -lim1, lim1)
    b1 = jax.random.uniform(k2, (1, HIDDEN), jnp.float32, -lim1, lim1)
    w2 = jax.random.uniform(k3, (HIDDEN, OUT), jnp.float32, -lim2, lim2)
    b2 = jax.random.uniform(k4, (1, OUT), jnp.float32, -lim2, lim2)
    return w1, b1, w2, b2


def reference_forward(x_nchw, w1, b1, w2, b2):
    x2 = x_nchw.reshape(x_nchw.shape[0], -1)
    h = jnp.maximum(
        jnp.dot(x2, w1, precision=jax.lax.Precision.HIGHEST) + b1, 0.0)
    return jnp.dot(h, w2, precision=jax.lax.Precision.HIGHEST) + b2


if __name__ == "__main__":
    key = jax.random.PRNGKey(0)
    k_x, k_p, k_x2 = jax.random.split(key, 3)

    w1, b1, w2, b2 = init_params(k_p)
    w1p, b1p, w2p, b2p = prepare_params(w1, b1, w2, b2)

    # Small deterministic input consistent with the module: batch=2, 1x28x28 images.
    x = jax.random.normal(k_x, (2, 1, 28, 28), jnp.float32)
    logits = jax.block_until_ready(mlp_forward(x, w1p, b1p, w2p, b2p))
    ref = reference_forward(x, w1, b1, w2, b2)
    assert logits.shape == (2, 10)
    assert jnp.allclose(logits, ref, atol=1e-3, rtol=1e-3), "mismatch vs JAX reference (B=2)"

    # Sanity-check the ragged last block + multi-step grid path (B not multiple of 8).
    xb = jax.random.normal(k_x2, (300, 1, 28, 28), jnp.float32)
    logits_b = jax.block_until_ready(mlp_forward(xb, w1p, b1p, w2p, b2p))
    ref_b = reference_forward(xb, w1, b1, w2, b2)
    assert logits_b.shape == (300, 10)
    assert jnp.allclose(logits_b, ref_b, atol=1e-3, rtol=1e-3), "mismatch vs JAX reference (B=300)"

    print("KERNEL_OK")
</pallas_src>

<mosaic_0001>
module attributes {stable_mosaic.version = 11 : i64} {
  func.func @mlp_kernel(%arg0: i32, %arg1: memref<8x784xf32, #tpu.memory_space<vmem>>, %arg2: memref<784x128xf32, #tpu.memory_space<vmem>>, %arg3: memref<1x128xf32, #tpu.memory_space<vmem>>, %arg4: memref<128x10xf32, #tpu.memory_space<vmem>>, %arg5: memref<1x10xf32, #tpu.memory_space<vmem>>, %arg6: memref<8x10xf32, #tpu.memory_space<vmem>>) attributes {dimension_semantics = [#tpu.dimension_semantics<parallel>], iteration_bounds = array<i64: 1>, scalar_prefetch = 0 : i64, scratch_operands = 0 : i64, tpu.core_type = #tpu.core_type<tc>, window_params = [{transform_indices = @transform_0, window_bounds = array<i64: 8, 784>}, {pipeline_mode = #tpu.pipeline_mode<synchronous>, transform_indices = @transform_1, window_bounds = array<i64: 784, 128>}, {pipeline_mode = #tpu.pipeline_mode<synchronous>, transform_indices = @transform_2, window_bounds = array<i64: 1, 128>}, {pipeline_mode = #tpu.pipeline_mode<synchronous>, transform_indices = @transform_3, window_bounds = array<i64: 128, 10>}, {pipeline_mode = #tpu.pipeline_mode<synchronous>, transform_indices = @transform_4, window_bounds = array<i64: 1, 10>}, {transform_indices = @transform_5, window_bounds = array<i64: 8, 10>}]} {
    %c0 = arith.constant 0 : index
    %c0_0 = arith.constant 0 : index
    %0 = vector.load %arg1[%c0, %c0_0] : memref<8x784xf32, #tpu.memory_space<vmem>>, vector<8x784xf32>
    %c0_1 = arith.constant 0 : index
    %c0_2 = arith.constant 0 : index
    %1 = vector.load %arg2[%c0_1, %c0_2] : memref<784x128xf32, #tpu.memory_space<vmem>>, vector<784x128xf32>
    %cst = arith.constant dense<0.000000e+00> : vector<8x128xf32>
    %2 = tpu.matmul %0, %1, %cst {dimension_numbers = #tpu.dot_dimension_numbers<[1], [0], [0], [1], [0, 0, 1, 1], [], []>} : vector<8x784xf32>, vector<784x128xf32>, vector<8x128xf32> -> vector<8x128xf32>
    %c0_3 = arith.constant 0 : index
    %c0_4 = arith.constant 0 : index
    %3 = vector.load %arg3[%c0_3, %c0_4] : memref<1x128xf32, #tpu.memory_space<vmem>>, vector<1x128xf32>
    %4 = vector.broadcast %3 : vector<1x128xf32> to vector<8x128xf32>
    %5 = arith.addf %2, %4 : vector<8x128xf32>
    %cst_5 = arith.constant 0.000000e+00 : f32
    %6 = vector.broadcast %cst_5 : f32 to vector<8x128xf32>
    %7 = arith.maximumf %5, %6 : vector<8x128xf32>
    %c0_6 = arith.constant 0 : index
    %c0_7 = arith.constant 0 : index
    %8 = vector.load %arg4[%c0_6, %c0_7] : memref<128x10xf32, #tpu.memory_space<vmem>>, vector<128x10xf32>
    %cst_8 = arith.constant dense<0.000000e+00> : vector<8x10xf32>
    %9 = tpu.matmul %7, %8, %cst_8 {dimension_numbers = #tpu.dot_dimension_numbers<[1], [0], [0], [1], [0, 0, 1, 1], [], []>} : vector<8x128xf32>, vector<128x10xf32>, vector<8x10xf32> -> vector<8x10xf32>
    %c0_9 = arith.constant 0 : index
    %c0_10 = arith.constant 0 : index
    %10 = vector.load %arg5[%c0_9, %c0_10] : memref<1x10xf32, #tpu.memory_space<vmem>>, vector<1x10xf32>
    %11 = vector.broadcast %10 : vector<1x10xf32> to vector<8x10xf32>
    %12 = arith.addf %9, %11 : vector<8x10xf32>
    %c0_11 = arith.constant 0 : index
    %c0_12 = arith.constant 0 : index
    %13 = vector.load %arg6[%c0_11, %c0_12] : memref<8x10xf32, #tpu.memory_space<vmem>>, vector<8x10xf32>
    tpu.vector_store %arg6[%c0_11, %c0_12], %12 {strides = array<i32>} : memref<8x10xf32, #tpu.memory_space<vmem>>, vector<8x10xf32>,
    return
  }
  func.func @transform_0(%arg0: i32) -> (i32, i32) {
    %c0_i32 = arith.constant 0 : i32
    %c0_i32_0 = arith.constant 0 : i32
    return %arg0, %c0_i32 : i32, i32
  }
  func.func @transform_1(%arg0: i32) -> (i32, i32) {
    %c0_i32 = arith.constant 0 : i32
    %c0_i32_0 = arith.constant 0 : i32
    %c0_i32_1 = arith.constant 0 : i32
    return %c0_i32, %c0_i32_0 : i32, i32
  }
  func.func @transform_2(%arg0: i32) -> (i32, i32) {
    %c0_i32 = arith.constant 0 : i32
    %c0_i32_0 = arith.constant 0 : i32
    %c0_i32_1 = arith.constant 0 : i32
    return %c0_i32, %c0_i32_0 : i32, i32
  }
  func.func @transform_3(%arg0: i32) -> (i32, i32) {
    %c0_i32 = arith.constant 0 : i32
    %c0_i32_0 = arith.constant 0 : i32
    %c0_i32_1 = arith.constant 0 : i32
    return %c0_i32, %c0_i32_0 : i32, i32
  }
  func.func @transform_4(%arg0: i32) -> (i32, i32) {
    %c0_i32 = arith.constant 0 : i32
    %c0_i32_0 = arith.constant 0 : i32
    %c0_i32_1 = arith.constant 0 : i32
    return %c0_i32, %c0_i32_0 : i32, i32
  }
  func.func @transform_5(%arg0: i32) -> (i32, i32) {
    %c0_i32 = arith.constant 0 : i32
    %c0_i32_0 = arith.constant 0 : i32
    return %arg0, %c0_i32 : i32, i32
  }
}

</mosaic_0001>

<bundles_post_ra>
// kernel: mlp_forward.1
= control target key start
LH: loop header
LB: loop body
LE: loop exit
PB: predicated region body
PF: predicated region fallthrough
CT: control target
= control target key end

     0   :  { %10 = vsyncpa [#allocation3], 0  ;;  %s569_s0 = inlined_call_operand.vmem [shape: f32[2,784], index: 0, kind: input, shape index: {}]   ;;  %s570_s1 = inlined_call_operand.hbm [shape: f32[784,128], index: 1, kind: input, shape index: {}]   ;;  %s571_s2 = inlined_call_operand.vmem [shape: f32[1,128], index: 2, kind: input, shape index: {}]   ;;  %s572_s3 = inlined_call_operand.vmem [shape: f32[128,10], index: 3, kind: input, shape index: {}]   ;;  %s573_s4 = inlined_call_operand.vmem [shape: f32[1,10], index: 4, kind: input, shape index: {}]   ;;  %s574_s5 = inlined_call_operand.hbm [shape: f32[2,10], index: 5, kind: output, shape index: {}]  }
   0x1   :  { %11 = vsyncpa [#allocation4], 0  ;;  %s18_s20 = sshll.u32 %s570_s1, 4  ;;  %s449_s21 = smov [#allocation2]   ;;  %s19_s20 = int_to_ptr.hbm [resolvable:$true] %s18_s20 }
   0x2   :  { %s20_s22 = sshll.u32 %s449_s21, 4  ;;  %s450_s23 = smov 128   ;;  %s21_s22 = int_to_ptr.vmem [resolvable:$true] %s20_s22 }
   0x3   :  { %s451_s24 = smov 8  }
   0x4   :  { %26 = dma.hbm_to_vmem [thread:$0]  %s19_s20, 12544, %s21_s22, [#allocation3], %s450_s23, %s450_s23, %s451_s24  }
   0x5   :  { %445 = dma.done.wait [#allocation3], 12544  }
   0x6   :  { %446 = vsyncadd [#allocation3], 4294954752  ;;  %v60_v0 = vld [vmem:[#allocation2 + $0x78] sm:$0xff]  ;;  %v59_v1 = vld [vmem:[#allocation2 + $0x70] sm:$0xff]  ;;  %vm183_vm0 = vcmask 130048   ;;  %vm367_vm1 = vcmask 80896  }
   0x7   :  { %v76_v2 = vld [vmem:[#allocation2 + $0xf8] sm:$0xff]  ;;  %186 = vmatpush.msra.mxu0 %v60_v0  ;;  %v75_v3 = vld [vmem:[#allocation2 + $0xf0] sm:$0xff]  ;;  %v58_v4 = vld [vmem:[#allocation2 + $0x68] sm:$0xff] }
   0x8   :  { %206 = vmatpush.msra.mxu1 %v76_v2  ;;  %v74_v5 = vld [vmem:[#allocation2 + $0xe8] sm:$0xff]  ;;  %v57_v6 = vld [vmem:[#allocation2 + $0x60] sm:$0xff]  ;;  %v56_v8 = vld [vmem:[#allocation2 + $0x58] sm:$0xff] }
   0x9   :  { %187 = vmatpush.msra.mxu0 %v59_v1  ;;  %v73_v7 = vld [vmem:[#allocation2 + $0xe0] sm:$0xff]  ;;  %v72_v9 = vld [vmem:[#allocation2 + $0xd8] sm:$0xff]  ;;  %v55_v10 = vld [vmem:[#allocation2 + $0x50] sm:$0xff] }
   0xa   :  { %207 = vmatpush.msra.mxu1 %v75_v3  ;;  %v92_v11 = vld [vmem:[#allocation2 + $0x178] sm:$0xff]  ;;  %v71_v12 = vld [vmem:[#allocation2 + $0xd0] sm:$0xff]  ;;  %v90_v15 = vld [vmem:[#allocation2 + $0x168] sm:$0xff] }
   0xb   :  { %188 = vmatpush.msra.mxu0 %v58_v4  ;;  %226 = vmatpush.msra.mxu2 %v92_v11  ;;  %v91_v13 = vld [vmem:[#allocation2 + $0x170] sm:$0xff]  ;;  %v108_v14 = vld [vmem:[#allocation2 + $0x1f8] sm:$0xff]  ;;  %v54_v17 = vld [vmem:[#allocation2 + $0x48] sm:$0xff] }
   0xc   :  { %208 = vmatpush.msra.mxu1 %v74_v5  ;;  %v107_v16 = vld [vmem:[#allocation2 + $0x1f0] sm:$0xff]  ;;  %v70_v18 = vld [vmem:[#allocation2 + $0xc8] sm:$0xff]  ;;  %246 = vmatpush.msra.mxu3 %v108_v14  ;;  %v89_v19 = vld [vmem:[#allocation2 + $0x160] sm:$0xff] }
   0xd   :  { %189 = vmatpush.msra.mxu0 %v57_v6  ;;  %227 = vmatpush.msra.mxu2 %v91_v13  ;;  %v106_v20 = vld [vmem:[#allocation2 + $0x1e8] sm:$0xff]  ;;  %v53_v21 = vld [vmem:[#allocation2 + $0x40] sm:$0xff]  ;;  %v88_v23 = vld [vmem:[#allocation2 + $0x158] sm:$0xff] }
   0xe   :  { %209 = vmatpush.msra.mxu1 %v73_v7  ;;  %v69_v22 = vld [vmem:[#allocation2 + $0xc0] sm:$0xff]  ;;  %247 = vmatpush.msra.mxu3 %v107_v16  ;;  %v52_v25 = vld [vmem:[#allocation2 + $0x38] sm:$0xff]  ;;  %v87_v27 = vld [vmem:[#allocation2 + $0x150] sm:$0xff] }
   0xf   :  { %190 = vmatpush.msra.mxu0 %v56_v8  ;;  %228 = vmatpush.msra.mxu2 %v90_v15  ;;  %v105_v24 = vld [vmem:[#allocation2 + $0x1e0] sm:$0xff]  ;;  %v68_v26 = vld [vmem:[#allocation2 + $0xb8] sm:$0xff]  ;;  %v51_v29 = vld [vmem:[#allocation2 + $0x30] sm:$0xff] }
  0x10   :  { %210 = vmatpush.msra.mxu1 %v72_v9  ;;  %248 = vmatpush.msra.mxu3 %v106_v20  ;;  %v104_v28 = vld [vmem:[#allocation2 + $0x1d8] sm:$0xff]  ;;  %v67_v30 = vld [vmem:[#allocation2 + $0xb0] sm:$0xff]  ;;  %v86_v31 = vld [vmem:[#allocation2 + $0x148] sm:$0xff] }
  0x11   :  { %191 = vmatpush.msra.mxu0 %v55_v10  ;;  %229 = vmatpush.msra.mxu2 %v89_v19  ;;  %v103_v32 = vld [vmem:[#allocation2 + $0x1d0] sm:$0xff]  ;;  %v50_v33 = vld [vmem:[#allocation2 + $0x28] sm:$0xff]  ;;  %v85_v35 = vld [vmem:[#allocation2 + $0x140] sm:$0xff] }
  0x12   :  { %211 = vmatpush.msra.mxu1 %v71_v12  ;;  %249 = vmatpush.msra.mxu3 %v105_v24  ;;  %v66_v34 = vld [vmem:[#allocation2 + $0xa8] sm:$0xff]  ;;  %v49_v37 = vld [vmem:[#allocation2 + $0x20] sm:$0xff]  ;;  %v84_v39 = vld [vmem:[#allocation2 + $0x138] sm:$0xff] }
  0x13   :  { %192 = vmatpush.msra.mxu0 %v54_v17  ;;  %230 = vmatpush.msra.mxu2 %v88_v23  ;;  %v102_v36 = vld [vmem:[#allocation2 + $0x1c8] sm:$0xff]  ;;  %v65_v38 = vld [vmem:[#allocation2 + $0xa0] sm:$0xff]  ;;  %v48_v41 = vld [vmem:[#allocation2 + $0x18] sm:$0xff] }
  0x14   :  { %212 = vmatpush.msra.mxu1 %v70_v18  ;;  %250 = vmatpush.msra.mxu3 %v104_v28  ;;  %v101_v40 = vld [vmem:[#allocation2 + $0x1c0] sm:$0xff]  ;;  %v64_v42 = vld [vmem:[#allocation2 + $0x98] sm:$0xff]  ;;  %v83_v43 = vld [vmem:[#allocation2 + $0x130] sm:$0xff] }
  0x15   :  { %193 = vmatpush.msra.mxu0 %v53_v21  ;;  %231 = vmatpush.msra.mxu2 %v87_v27  ;;  %v100_v44 = vld [vmem:[#allocation2 + $0x1b8] sm:$0xff]  ;;  %v47_v45 = vld [vmem:[#allocation2 + $0x10] sm:$0xff]  ;;  %v82_v47 = vld [vmem:[#allocation2 + $0x128] sm:$0xff] }
  0x16   :  { %213 = vmatpush.msra.mxu1 %v69_v22  ;;  %251 = vmatpush.msra.mxu3 %v103_v32  ;;  %v63_v46 = vld [vmem:[#allocation2 + $0x90] sm:$0xff]  ;;  %v46_v49 = vld [vmem:[#allocation2 + $0x8] sm:$0xff]  ;;  %v45_v50 = vld [vmem:[#allocation2] sm:$0xff] }
  0x17   :  { %194 = vmatpush.msra.mxu0 %v52_v25  ;;  %232 = vmatpush.msra.mxu2 %v86_v31  ;;  %v99_v48 = vld [vmem:[#allocation2 + $0x1b0] sm:$0xff]  ;;  %v62_v51 = vld [vmem:[#allocation2 + $0x88] sm:$0xff]  ;;  %v61_v52 = vld [vmem:[#allocation2 + $0x80] sm:$0xff] }
  0x18   :  { %214 = vmatpush.msra.mxu1 %v68_v26  ;;  %252 = vmatpush.msra.mxu3 %v102_v36  ;;  %v81_v53 = vld [vmem:[#allocation2 + $0x120] sm:$0xff]  ;;  %v98_v54 = vld [vmem:[#allocation2 + $0x1a8] sm:$0xff]  ;;  %v37_v55 = vld [vmem:[%s569_s0] sm:$0xff] }
  0x19   :  { %195 = vmatpush.msra.mxu0 %v51_v29  ;;  %233 = vmatpush.msra.mxu2 %v85_v35  ;;  %v39_v56 = vld [vmem:[%s569_s0 + $0xe] sm:$0xff]  ;;  %v41_v57 = vld [vmem:[%s569_s0 + $0x1c] sm:$0xff]  ;;  %155 = vst [vmem:[#allocation1] ss:$4 sm:$0xff] %v37_v55  ;;  %v38_v5 = vld [vmem:[%s569_s0 + $0x8] sm:$0x3f] }
  0x1a   :  { %215 = vmatpush.msra.mxu1 %v67_v30  ;;  %253 = vmatpush.msra.mxu3 %v101_v40  ;;  %v124_v58 = vld [vmem:[#allocation2 + $0x278] sm:$0xff]  ;;  %v43_v60 = vld [vmem:[%s569_s0 + $0x2a] sm:$0xff]  ;;  %157 = vst [vmem:[#allocation1 + $0x1] ss:$4 sm:$0xff] %v39_v56  ;;  %v123_v63 = vld [vmem:[#allocation2 + $0x270] sm:$0xff] }
  0x1b   :  { %196 = vmatpush.msra.mxu0 %v50_v33  ;;  %234 = vmatpush.msra.mxu2 %v84_v39  ;;  %v140_v59 = vld [vmem:[#allocation2 + $0x2f8] sm:$0xff]  ;;  %v97_v62 = vld [vmem:[#allocation2 + $0x1a0] sm:$0xff]  ;;  %v122_v0 = vld [vmem:[#allocation2 + $0x268] sm:$0xff]  ;;  %159 = vst [vmem:[#allocation1 + $0x2] ss:$4 sm:$0xff] %v41_v57 }
  0x1c   :  { %216 = vmatpush.msra.mxu1 %v66_v34  ;;  %254 = vmatpush.msra.mxu3 %v100_v44  ;;  %v80_v61 = vld [vmem:[#allocation2 + $0x118] sm:$0xff]  ;;  %v139_v1 = vld [vmem:[#allocation2 + $0x2f0] sm:$0xff]  ;;  %v138_v2 = vld [vmem:[#allocation2 + $0x2e8] sm:$0xff]  ;;  %161 = vst [vmem:[#allocation1 + $0x3] ss:$4 sm:$0xff] %v43_v60 }
  0x1d   :  { %197 = vmatpush.msra.mxu0 %v49_v37  ;;  %235 = vmatpush.msra.mxu2 %v83_v43  ;;  %v79_v3 = vld [vmem:[#allocation2 + $0x110] sm:$0xff]  ;;  %v96_v4 = vld [vmem:[#allocation2 + $0x198] sm:$0xff]  ;;  %v78_v8 = vld [vmem:[#allocation2 + $0x108] sm:$0xff]  ;;  %163 = vst [vmem:[#allocation1 + $0x20] ss:$4 sm:$0xff] %v38_v5 }
  0x1e   :  { %217 = vmatpush.msra.mxu1 %v65_v38  ;;  %255 = vmatpush.msra.mxu3 %v99_v48  ;;  %v40_v6 = vld [vmem:[%s569_s0 + $0x16] sm:$0x3f]  ;;  %v42_v7 = vld [vmem:[%s569_s0 + $0x24] sm:$0x3f] }
  0x1f   :  { %198 = vmatpush.msra.mxu0 %v48_v41  ;;  %236 = vmatpush.msra.mxu2 %v82_v47  ;;  %v95_v9 = vld [vmem:[#allocation2 + $0x190] sm:$0xff]  ;;  %v44_v10 = vld [vmem:[%s569_s0 + $0x32] sm:$0x3f]  ;;  %v121_v11 = vld [vmem:[#allocation2 + $0x260] sm:$0xff]  ;;  %165 = vst [vmem:[#allocation1 + $0x21] ss:$4 sm:$0xff] %v40_v6 }
  0x20   :  { %218 = vmatpush.msra.mxu1 %v64_v42  ;;  %256 = vmatpush.msra.mxu3 %v98_v54  ;;  %v137_v12 = vld [vmem:[#allocation2 + $0x2e0] sm:$0xff]  ;;  %v94_v14 = vld [vmem:[#allocation2 + $0x188] sm:$0xff]  ;;  %167 = vst [vmem:[#allocation1 + $0x22] ss:$4 sm:$0xff] %v42_v7  ;;  %v120_v15 = vld [vmem:[#allocation2 + $0x258] sm:$0xff] }
  0x21   :  { %199 = vmatpush.msra.mxu0 %v47_v45  ;;  %237 = vmatpush.msra.mxu2 %v81_v53  ;;  %v77_v13 = vld [vmem:[#allocation2 + $0x100] sm:$0xff]  ;;  %v136_v16 = vld [vmem:[#allocation2 + $0x2d8] sm:$0xff]  ;;  %169 = vst [vmem:[#allocation1 + $0x23] ss:$4 sm:$0xff] %v44_v10  ;;  %v119_v18 = vld [vmem:[#allocation2 + $0x250] sm:$0xff] }
  0x22   :  { %219 = vmatpush.msra.mxu1 %v63_v46  ;;  %257 = vmatpush.msra.mxu3 %v97_v62  ;;  %v93_v17 = vld [vmem:[#allocation2 + $0x180] sm:$0xff]  ;;  %v135_v19 = vld [vmem:[#allocation2 + $0x2d0] sm:$0xff]  ;;  %v142_v21 = vld [vmem:[#allocation2 + $0x308] sm:$0xff] }
  0x23   :  { %200 = vmatpush.msra.mxu0 %v46_v49  ;;  %238 = vmatpush.msra.mxu2 %v80_v61  ;;  %v172_v20 = vld.sshfl [vmem:[#allocation1 + $0x10] sm:$0xff pattern:$0x73625140]  ;;  %v170_v22 = vld.sshfl [vmem:[#allocation1] sm:$0xff pattern:$0x73625140] }
  0x24   :  { %220 = vmatpush.msra.mxu1 %v62_v51  ;;  %258 = vmatpush.msra.mxu3 %v96_v4  ;;  %v118_v23 = vld [vmem:[#allocation2 + $0x248] sm:$0xff]  ;;  %v173_v25 = vld.sshfl [vmem:[#allocation1 + $0x18] sm:$0xff pattern:$0x73625140]  ;;  %v117_v27 = vld [vmem:[#allocation2 + $0x240] sm:$0xff] }
  0x25   :  { %201 = vmatpush.msra.mxu0 %v45_v50  ;;  %239 = vmatpush.msra.mxu2 %v79_v3  ;;  %v134_v24 = vld [vmem:[#allocation2 + $0x2c8] sm:$0xff]  ;;  %v171_v26 = vld.sshfl [vmem:[#allocation1 + $0x8] sm:$0xff pattern:$0x73625140]  ;;  %v342_v30 = vld [vmem:[%s572_s3 + $0x78] sm:$0xff] }
  0x26   :  { %221 = vmatpush.msra.mxu1 %v61_v52  ;;  %259 = vmatpush.msra.mxu3 %v95_v9  ;;  %v133_v28 = vld [vmem:[#allocation2 + $0x2c0] sm:$0xff]  ;;  %v116_v31 = vld [vmem:[#allocation2 + $0x238] sm:$0xff]  ;;  %v341_v34 = vld [vmem:[%s572_s3 + $0x70] sm:$0xff] }
  0x27   :  { %266 = vmatpush.msrb.mxu0 %v124_v58  ;;  %240 = vmatpush.msra.mxu2 %v78_v8  ;;  %v141_v29 = vld [vmem:[#allocation2 + $0x300] sm:$0xff]  ;;  %v132_v32 = vld [vmem:[#allocation2 + $0x2b8] sm:$0xff]  ;;  %v115_v35 = vld [vmem:[#allocation2 + $0x230] sm:$0xff] }
  0x28   :  { %286 = vmatpush.msrb.mxu1 %v140_v59  ;;  %260 = vmatpush.msra.mxu3 %v94_v14  ;;  %v176_v33 = vld.sshfl [vmem:[#allocation1 + $0x30] sm:$0xff pattern:$0x73625140]  ;;  %v131_v36 = vld [vmem:[#allocation2 + $0x2b0] sm:$0xff]  ;;  %v340_v37 = vld [vmem:[%s572_s3 + $0x68] sm:$0xff] }
  0x29   :  { %267 = vmatpush.msrb.mxu0 %v123_v63  ;;  %241 = vmatpush.msra.mxu2 %v77_v13  ;;  %v114_v38 = vld [vmem:[#allocation2 + $0x228] sm:$0xff]  ;;  %v339_v40 = vld [vmem:[%s572_s3 + $0x60] sm:$0xff]  ;;  %v113_v41 = vld [vmem:[#allocation2 + $0x220] sm:$0xff] }
  0x2a   :  { %287 = vmatpush.msrb.mxu1 %v139_v1  ;;  %242 = vmatmul.f32.vlgmr.msra.gmra.mxu2 %v172_v20  ;;  %v130_v39 = vld [vmem:[#allocation2 + $0x2a8] sm:$0xff]  ;;  %v129_v42 = vld [vmem:[#allocation2 + $0x2a0] sm:$0xff]  ;;  %v338_v43 = vld [vmem:[%s572_s3 + $0x58] sm:$0xff] }
  0x2b   :  { %268 = vmatpush.msrb.mxu0 %v122_v0  ;;  %261 = vmatpush.msra.mxu3 %v93_v17  ;;  %v112_v44 = vld [vmem:[#allocation2 + $0x218] sm:$0xff]  ;;  %v337_v46 = vld [vmem:[%s572_s3 + $0x50] sm:$0xff]  ;;  %v111_v47 = vld [vmem:[#allocation2 + $0x210] sm:$0xff] }
  0x2c   :  { %288 = vmatpush.msrb.mxu1 %v138_v2  ;;  %320 = vmatpush.msrb.mxu2 %v142_v21  ;;  %v128_v45 = vld [vmem:[#allocation2 + $0x298] sm:$0xff]  ;;  %v127_v48 = vld [vmem:[#allocation2 + $0x290] sm:$0xff]  ;;  %v336_v49 = vld [vmem:[%s572_s3 + $0x48] sm:$0xff] }
  0x2d   :  { %269 = vmatpush.msrb.mxu0 %v121_v11  ;;  %262 = vmatmul.f32.vlgmr.msra.gmra.mxu3 %v173_v25  ;;  %v110_v50 = vld [vmem:[#allocation2 + $0x208] sm:$0xff]  ;;  %v109_v52 = vld [vmem:[#allocation2 + $0x200] sm:$0xff]  ;;  %v174_v54 = vld.sshfl [vmem:[#allocation1 + $0x20] sm:$0xff pattern:$0x73625140] }
  0x2e   :  { %289 = vmatpush.msrb.mxu1 %v137_v12  ;;  %202 = vmatmul.f32.vlgmr.msra.gmra.mxu0 %v170_v22  ;;  %v126_v51 = vld [vmem:[#allocation2 + $0x288] sm:$0xff]  ;;  %v125_v53 = vld [vmem:[#allocation2 + $0x280] sm:$0xff]  ;;  %v335_v56 = vld [vmem:[%s572_s3 + $0x40] sm:$0xff] }
  0x2f   :  { %270 = vmatpush.msrb.mxu0 %v120_v15  ;;  %222 = vmatmul.f32.vlgmr.msra.gmra.mxu1 %v171_v26  ;;  %v175_v55 = vld.sshfl [vmem:[#allocation1 + $0x28] sm:$0xff pattern:$0x73625140]  ;;  %v334_v57 = vld [vmem:[%s572_s3 + $0x38] sm:$0xff]  ;;  %v333_v58 = vld [vmem:[%s572_s3 + $0x30] sm:$0xff] }
  0x30   :  { %290 = vmatpush.msrb.mxu1 %v136_v16  ;;  %321 = vmatpush.msrb.mxu2 %v141_v29  ;;  %v332_v59 = vld [vmem:[%s572_s3 + $0x28] sm:$0xff]  ;;  %v331_v60 = vld [vmem:[%s572_s3 + $0x20] sm:$0xff]  ;;  %v330_v61 = vld [vmem:[%s572_s3 + $0x18] sm:$0xff] }
  0x31   :  { %271 = vmatpush.msrb.mxu0 %v119_v18  ;;  %347 = vmatpush.msrb.mxu3 %v342_v30  ;;  %v329_v62 = vld [vmem:[%s572_s3 + $0x10] sm:$0xff]  ;;  %v328_v63 = vld [vmem:[%s572_s3 + $0x8] sm:$0xff]  ;;  %v327_v0 = vld [vmem:[%s572_s3] sm:$0xff] }
  0x32   :  { %291 = vmatpush.msrb.mxu1 %v135_v19  ;;  %388 = vmatmul.msk.f32.vlgmr.msrb.gmra.mxu2 %vm183_vm0, %v176_v33  ;;  %v395_v1 = vld [vmem:[%s571_s2] ss:$0 sm:$0xff] }
  0x33   :  { %272 = vmatpush.msrb.mxu0 %v118_v23  ;;  %348 = vmatpush.msrb.mxu3 %v341_v34  ;;  %v396_v17 = vld [vmem:[%s573_s4] ss:$0 sm:$0xff] }
  0x34   :  { %292 = vmatpush.msrb.mxu1 %v134_v24 }
  0x35   :  { %273 = vmatpush.msrb.mxu0 %v117_v27  ;;  %349 = vmatpush.msrb.mxu3 %v340_v37 }
  0x36   :  { %293 = vmatpush.msrb.mxu1 %v133_v28 }
  0x37   :  { %274 = vmatpush.msrb.mxu0 %v116_v31  ;;  %350 = vmatpush.msrb.mxu3 %v339_v40 }
  0x38   :  { %294 = vmatpush.msrb.mxu1 %v132_v32 }
  0x39   :  { %275 = vmatpush.msrb.mxu0 %v115_v35  ;;  %351 = vmatpush.msrb.mxu3 %v338_v43 }
  0x3a   :  { %295 = vmatpush.msrb.mxu1 %v131_v36 }
  0x3b   :  { %276 = vmatpush.msrb.mxu0 %v114_v38  ;;  %352 = vmatpush.msrb.mxu3 %v337_v46 }
  0x3c   :  { %296 = vmatpush.msrb.mxu1 %v130_v39 }
  0x3d   :  { %277 = vmatpush.msrb.mxu0 %v113_v41  ;;  %353 = vmatpush.msrb.mxu3 %v336_v49 }
  0x3e   :  { %297 = vmatpush.msrb.mxu1 %v129_v42 }
  0x3f   :  { %278 = vmatpush.msrb.mxu0 %v112_v44  ;;  %354 = vmatpush.msrb.mxu3 %v335_v56 }
  0x40   :  { %298 = vmatpush.msrb.mxu1 %v128_v45 }
  0x41   :  { %279 = vmatpush.msrb.mxu0 %v111_v47  ;;  %355 = vmatpush.msrb.mxu3 %v334_v57 }
  0x42   :  { %299 = vmatpush.msrb.mxu1 %v127_v48 }
  0x43   :  { %280 = vmatpush.msrb.mxu0 %v110_v50  ;;  %356 = vmatpush.msrb.mxu3 %v333_v58 }
  0x44   :  { %300 = vmatpush.msrb.mxu1 %v126_v51 }
  0x45   :  { %281 = vmatpush.msrb.mxu0 %v109_v52  ;;  %357 = vmatpush.msrb.mxu3 %v332_v59 }
  0x46   :  { %301 = vmatpush.msrb.mxu1 %v125_v53  ;;  %282 = vmatmul.f32.vlgmr.msrb.gmra.mxu0 %v174_v54 }
  0x47   :  { %302 = vmatmul.f32.vlgmr.msrb.gmra.mxu1 %v175_v55  ;;  %358 = vmatpush.msrb.mxu3 %v331_v60 }
  0x49   :  { %359 = vmatpush.msrb.mxu3 %v330_v61 }
  0x4b   :  { %360 = vmatpush.msrb.mxu3 %v329_v62 }
  0x4d   :  { %361 = vmatpush.msrb.mxu3 %v328_v63 }
  0x4f   :  { %362 = vmatpush.msrb.mxu3 %v327_v0 }
  0xab   :  { %v203_v2 = vpop.f32.mrf.mxu0 }
  0xac   :  { %v204_v3 = vadd.f32 %v395_v1, %v203_v2  ;;  %v223_v4 = vpop.f32.mrf.mxu1 }
  0xad   :  { %v243_v6 = vpop.f32.mrf.mxu2 }
  0xae   :  { %v224_v5 = vadd.f32 %v223_v4, %v204_v3 }
  0xb0   :  { %v244_v7 = vadd.f32 %v243_v6, %v224_v5  ;;  %v263_v8 = vpop.f32.mrf.mxu3 }
  0xb2   :  { %v264_v9 = vadd.f32 %v263_v8, %v244_v7 }
  0xb5   :  { %v323_v13 = vpop.f32.mrf.mxu2 }
  0xc3   :  { %v283_v10 = vpop.f32.mrf.mxu0 }
  0xc4   :  { %v303_v11 = vpop.f32.mrf.mxu1  ;;  %v284_v12 = vadd.f32 %v283_v10, %v264_v9 }
  0xc6   :  { %v304_v14 = vadd.f32 %v303_v11, %v284_v12 }
  0xc8   :  { %v324_v15 = vadd.f32 %v323_v13, %v304_v14 }
  0xca   :  { %v326_v16 = vmax.f32 %v324_v15, 0.0 }
  0xcc   :  { %363 = vmatmul.f32.vlgmr.msrb.gmra.mxu3 %v326_v16 }
 0x14f   :  { %v364_v18 = vpop.f32.mrf.mxu3 }
 0x150   :  { %v365_v19 = vadd.f32 %v396_v17, %v364_v18 }
 0x152   :  { %368 = vst.msk [vmem:[#allocation5] sm:$0xff] %vm367_vm1, %v365_v19 }
 0x153   :  { %372 = vsyncadd [#allocation4], 96  ;;  %s375_s23 = sshll.u32 %s574_s5, 4  ;;  %s452_s24 = smov [#allocation5]   ;;  %s376_s23 = int_to_ptr.hbm [resolvable:$true] %s375_s23 }
 0x154   :  { %s373_s1 = sshll.u32 %s452_s24, 4  ;;  %s453_s25 = smov 32   ;;  %s374_s1 = int_to_ptr.vmem [resolvable:$true] %s373_s1 }
 0x155   :  { %s454_s26 = smov 2  }
 0x156   :  { %381 = dma.vmem_to_hbm [thread:$0]  %s374_s1, 32, %s376_s23, [#allocation4], %s453_s25, %s453_s25, %s454_s26  }
 0x157   :  { %447 = dma.done.wait [#allocation4], 128  }
 0x158   :  { %448 = vsyncadd [#allocation4], 4294967168 }
 0x159   :  { %386 = vsyncpa [#allocation3], 1 }
 0x15a   :  { %387 = vsyncpa [#allocation4], 1 }

</bundles_post_ra>
